<compile_context>
chip_gen: v7x
topology: tpu7x:2x2x1
jax: 0.10.0
libtpu: 0.0.40
codegen_flags: <defaults>
</compile_context>

<pallas_src>
import functools

import jax
import jax.numpy as jnp
from jax.experimental import pallas as pl
from jax.experimental.pallas import tpu as pltpu


def _round_up(x, m):
    return ((x + m - 1) // m) * m


# ----------------------------- Kernel 1: channel max ------------------------
def _chan_max_kernel(x_ref, o_ref):
    # x_ref: (TILE, C)  ->  o_ref: (TILE, 1)
    o_ref[...] = jnp.max(x_ref[...], axis=-1, keepdims=True)


def channel_max(x_bhwc, *, target_block_bytes=2 * 1024 * 1024, max_tile=2048):
    """(B, H, W, C) -> (B, H*W) max over the channel axis, tiled + pipelined."""
    B, H, W, C = x_bhwc.shape
    rows = B * H * W
    x = x_bhwc.reshape(rows, C)          # free for contiguous NHWC

    bytes_per_row = C * x.dtype.itemsize
    tile = (target_block_bytes // max(bytes_per_row, 1)) // 8 * 8
    tile = max(8, min(tile, max_tile, _round_up(rows, 8)))

    out = pl.pallas_call(
        _chan_max_kernel,
        out_shape=jax.ShapeDtypeStruct((rows, 1), x.dtype),
        grid_spec=pltpu.PrefetchScalarGridSpec(
            num_scalar_prefetch=0,
            grid=(pl.cdiv(rows, tile),),          # partial last block is masked
            in_specs=[pl.BlockSpec((tile, C), lambda i: (i, 0))],
            out_specs=pl.BlockSpec((tile, 1), lambda i: (i, 0)),
        ),
        compiler_params=pltpu.CompilerParams(
            dimension_semantics=("parallel",)),
    )(x)
    return out[:, 0].reshape(B, H * W)


# ------------------------ Kernel 2: two chained matmuls ---------------------
def _safa_kernel(vec1_ref, w1_ref, b1_ref, w2_ref, b2_ref, o_ref, *, td, hw2_p):
    # vec1_ref: (B, HW_p)           w1_ref: (HW_p, Td*HW2_p)  b1_ref: (1, Td*HW2_p)
    # w2_ref:   (Td, HW2_p, HW_p)   b2_ref: (Td, 1, HW_p)     o_ref:  (Td, B, HW_p)
    vec1 = vec1_ref[...]
    # First matmul covers all Td dims at once: N = Td*HW2_p lanes fully used.
    vec2 = jnp.dot(vec1, w1_ref[...],
                   preferred_element_type=jnp.float32) + b1_ref[...]
    # Second matmul is genuinely per-d (block-diagonal contraction over j).
    # Td is small and static -> fully unrolled, lane-aligned static slices.
    for t in range(td):
        v2_t = vec2[:, t * hw2_p:(t + 1) * hw2_p]
        v3_t = jnp.dot(v2_t, w2_ref[t],
                       preferred_element_type=jnp.float32) + b2_ref[t]
        o_ref[t] = v3_t.astype(o_ref.dtype)


def spatial_aware(input_feature, weights1, bias1, weights2, bias2, *, d_block=4):
    """Pallas implementation of SAFA_smi.spatial_aware.

    input_feature: (B, H, W, C) float32 (NHWC, as in the TF reference)
    weights1: (HW, HW2, D)   bias1: (1, HW2, D)
    weights2: (HW2, HW, D)   bias2: (1, HW, D)
    returns   (B, HW, D) float32
    """
    B, H, W, C = input_feature.shape
    HW = H * W
    HW_w1, HW2, D = weights1.shape
    assert HW_w1 == HW

    # Lane-align spatial dims: unmasked stores + MXU-aligned K/N tiles.
    HW_p = _round_up(HW, 128)
    HW2_p = _round_up(HW2, 128)

    # d's per grid step: divisor of D, keep >= 2 steps for the two v7x TCs.
    td = max(1, min(d_block, D // 2)) if D > 1 else 1
    while D % td:
        td -= 1

    # vec1 = channel max, zero-padded to HW_p lanes (zeros don't affect dots;
    # vec1 is tiny, so this pad is negligible).
    vec1 = channel_max(input_feature)                               # (B, HW)
    vec1 = jnp.pad(vec1, ((0, 0), (0, HW_p - HW)))                  # (B, HW_p)

    # One-time parameter layout prep (plain JAX glue; hoist/cache in real use):
    #   W1 -> (HW_p, D*HW2_p)   (D folded into the lane/N dimension)
    #   W2 -> (D, HW2_p, HW_p)  (D-major, dense per-d matmuls)
    # Optional: cast W1/W2 to bfloat16 here to halve weight DMA traffic.
    w1_p = jnp.pad(weights1, ((0, HW_p - HW), (0, HW2_p - HW2), (0, 0)))
    w1_2d = jnp.transpose(w1_p, (0, 2, 1)).reshape(HW_p, D * HW2_p)
    b1_p = jnp.pad(bias1, ((0, 0), (0, HW2_p - HW2), (0, 0)))
    b1_2d = jnp.transpose(b1_p, (0, 2, 1)).reshape(1, D * HW2_p)
    w2_d = jnp.transpose(
        jnp.pad(weights2, ((0, HW2_p - HW2), (0, HW_p - HW), (0, 0))), (2, 0, 1))
    b2_d = jnp.transpose(
        jnp.pad(bias2, ((0, 0), (0, HW_p - HW), (0, 0))), (2, 0, 1))

    out_dbi = pl.pallas_call(
        functools.partial(_safa_kernel, td=td, hw2_p=HW2_p),
        out_shape=jax.ShapeDtypeStruct((D, B, HW_p), jnp.float32),
        grid_spec=pltpu.PrefetchScalarGridSpec(
            num_scalar_prefetch=0,
            grid=(D // td,),
            in_specs=[
                pl.BlockSpec((B, HW_p), lambda g: (0, 0)),             # vec1 (resident)
                pl.BlockSpec((HW_p, td * HW2_p), lambda g: (0, g)),    # W1 block
                pl.BlockSpec((1, td * HW2_p), lambda g: (0, g)),       # b1 block
                pl.BlockSpec((td, HW2_p, HW_p), lambda g: (g, 0, 0)),  # W2 block
                pl.BlockSpec((td, 1, HW_p), lambda g: (g, 0, 0)),      # b2 block
            ],
            out_specs=pl.BlockSpec((td, B, HW_p), lambda g: (g, 0, 0)),
        ),
        compiler_params=pltpu.CompilerParams(
            dimension_semantics=("parallel",),
            vmem_limit_bytes=32 * 1024 * 1024,
        ),
    )(vec1, w1_2d, b1_2d, w2_d, b2_d)

    # Slice off spatial padding and return the reference (B, HW, D) layout.
    # Consumers that accept the D-major (D, B, HW_p) layout can take out_dbi
    # directly and skip this transpose (it is one extra pass over the output).
    return jnp.transpose(out_dbi[:, :, :HW], (1, 2, 0))


# ------------------------------- Reference ----------------------------------
def spatial_aware_ref(x_bhwc, weights1, bias1, weights2, bias2):
    B, H, W, C = x_bhwc.shape
    vec1 = jnp.max(x_bhwc, axis=-1).reshape(B, H * W)
    vec2 = jnp.einsum('bi,ijd->bjd', vec1, weights1) + bias1
    vec3 = jnp.einsum('bjd,jid->bid', vec2, weights2) + bias2
    return vec3


if __name__ == "__main__":
    # Small shapes consistent with the module (original: H=W=20, dim=args.dim).
    B, H, W, C, D = 2, 4, 4, 8, 8
    HW = H * W
    HW2 = HW // 2

    key = jax.random.PRNGKey(0)
    k_x, k_w1, k_w2 = jax.random.split(key, 3)

    x = jax.random.normal(k_x, (B, H, W, C), dtype=jnp.float32)

    # Param init mirroring the module: weights ~ N(0, 0.005), biases = 0.1,
    # stored in the reference (TF) layouts.
    weights1 = 0.005 * jax.random.normal(k_w1, (HW, HW2, D), dtype=jnp.float32)
    bias1 = jnp.full((1, HW2, D), 0.1, dtype=jnp.float32)
    weights2 = 0.005 * jax.random.normal(k_w2, (HW2, HW, D), dtype=jnp.float32)
    bias2 = jnp.full((1, HW, D), 0.1, dtype=jnp.float32)

    out = spatial_aware(x, weights1, bias1, weights2, bias2)
    out = jax.block_until_ready(out)

    ref = spatial_aware_ref(x, weights1, bias1, weights2, bias2)
    assert out.shape == (B, HW, D), out.shape
    assert jnp.allclose(out, ref, atol=1e-4, rtol=1e-4), \
        float(jnp.max(jnp.abs(out - ref)))

    # TODO(synk): the VGG16-BN backbones referenced in __init__ are never used
    # in the provided forward/spatial_aware path, so they are not implemented.
    print("KERNEL_OK")
</pallas_src>

<mosaic_0001>
module attributes {stable_mosaic.version = 11 : i64} {
  func.func @_chan_max_kernel(%arg0: i32, %arg1: memref<32x8xf32, #tpu.memory_space<vmem>>, %arg2: memref<32x1xf32, #tpu.memory_space<vmem>>) attributes {dimension_semantics = [#tpu.dimension_semantics<parallel>], iteration_bounds = array<i64: 1>, scalar_prefetch = 0 : i64, scratch_operands = 0 : i64, tpu.core_type = #tpu.core_type<tc>, window_params = [{transform_indices = @transform_0, window_bounds = array<i64: 32, 8>}, {transform_indices = @transform_1, window_bounds = array<i64: 32, 1>}]} {
    %c0 = arith.constant 0 : index
    %c0_0 = arith.constant 0 : index
    %0 = vector.load %arg1[%c0, %c0_0] : memref<32x8xf32, #tpu.memory_space<vmem>>, vector<32x8xf32>
    %cst = arith.constant dense<0xFF800000> : vector<32xf32>
    %1 = vector.multi_reduction <maximumf>, %0, %cst [1] : vector<32x8xf32> to vector<32xf32>
    %2 = vector.shape_cast %1 : vector<32xf32> to vector<32x1xf32>
    %c0_1 = arith.constant 0 : index
    %c0_2 = arith.constant 0 : index
    %3 = vector.load %arg2[%c0_1, %c0_2] : memref<32x1xf32, #tpu.memory_space<vmem>>, vector<32x1xf32>
    tpu.vector_store %arg2[%c0_1, %c0_2], %2 {strides = array<i32>} : memref<32x1xf32, #tpu.memory_space<vmem>>, vector<32x1xf32>,
    return
  }
  func.func @transform_0(%arg0: i32) -> (i32, i32) {
    %c0_i32 = arith.constant 0 : i32
    %c0_i32_0 = arith.constant 0 : i32
    return %arg0, %c0_i32 : i32, i32
  }
  func.func @transform_1(%arg0: i32) -> (i32, i32) {
    %c0_i32 = arith.constant 0 : i32
    %c0_i32_0 = arith.constant 0 : i32
    return %arg0, %c0_i32 : i32, i32
  }
}

</mosaic_0001>

<bundles_post_ra>
// kernel: tpu_custom_call.1
= control target key start
LH: loop header
LB: loop body
LE: loop exit
PB: predicated region body
PF: predicated region fallthrough
CT: control target
= control target key end

     0   :  { %vm12_vm0 = vcmask 64512   ;;  %vm25_vm1 = vcmask 7168   ;;  %s68_s0 = inlined_call_operand.vmem [shape: f32[32,8], index: 0, kind: input, shape index: {}]   ;;  %s69_s1 = inlined_call_operand.vmem [shape: f32[32,1], index: 1, kind: output, shape index: {}]  }
   0x1   :  { %v10_v0 = vld [vmem:[%s68_s0 + $0x10] sm:$0xff]  ;;  %v8_v1 = vld [vmem:[%s68_s0] sm:$0xff]  ;;  %v11_v2 = vld [vmem:[%s68_s0 + $0x18] sm:$0xff] }
   0x2   :  { %v19_v3 = vsel %vm12_vm0, %v10_v0, -inf  ;;  %v13_v4 = vsel %vm12_vm0, %v8_v1, -inf  ;;  %v9_v5 = vld [vmem:[%s68_s0 + $0x8] sm:$0xff]  ;;  %v22_v6 = vsel %vm12_vm0, %v11_v2, -inf }
   0x3   :  { %20 = vmax.xlane.f32.xlu1 %v19_v3  ;;  %14 = vmax.xlane.f32.xlu0 %v13_v4  ;;  %v16_v7 = vsel %vm12_vm0, %v9_v5, -inf }
   0x7   :  { %23 = vmax.xlane.f32.xlu1 %v22_v6  ;;  %17 = vmax.xlane.f32.xlu0 %v16_v7 }
  0x90   :  { %v21_v8 = vpop.xlane.xlu1 %20  ;;  %v15_v9 = vpop.xlane.xlu0 %14 }
  0x91   :  { %28 = vst.msk [vmem:[%s69_s1 + $0x10] sm:$0xff] %vm25_vm1, %v21_v8  ;;  %26 = vst.msk [vmem:[%s69_s1] sm:$0xff] %vm25_vm1, %v15_v9 }
  0x94   :  { %v24_v10 = vpop.xlane.xlu1 %23  ;;  %v18_v11 = vpop.xlane.xlu0 %17 }
  0x95   :  { %29 = vst.msk [vmem:[%s69_s1 + $0x18] sm:$0xff] %vm25_vm1, %v24_v10  ;;  %27 = vst.msk [vmem:[%s69_s1 + $0x8] sm:$0xff] %vm25_vm1, %v18_v11 }

</bundles_post_ra>
